<compile_context>
chip_gen: v6e
topology: v6e:2x2x1
jax: 0.10.0
libtpu: 0.0.40
codegen_flags: <defaults>
</compile_context>

<pallas_src>
import jax
import jax.numpy as jnp
from jax import lax
from jax.experimental import pallas as pl
from jax.experimental.pallas import tpu as pltpu

COMPUTE_DTYPE = jnp.bfloat16  # MXU operand / HBM-slab dtype; accumulation stays f32.


def _round_up(x, m):
    return (x + m - 1) // m * m


def _device_kind():
    try:
        return jax.devices()[0].device_kind.lower()
    except Exception:
        return ""


def _tensorcores_per_chip(kind):
    # v7x exposes 2 TensorCores per chip; v5e/v6e have 1.
    return 2 if "v7" in kind else 1


def _vmem_limit_bytes(kind):
    # v7x: 64 MiB physical VMEM -> stay well under it.
    # v5e/v6e: 128 MiB physical but only 16/32 MiB default scoped limit -> raise it.
    return (48 if "v7" in kind else 96) * 1024 * 1024


def _default_head_tiles(kind):
    if "v5" in kind:
        return 256, 256   # 4x128x128 MXU, small default scoped VMEM
    if "v7" in kind:
        return 256, 512   # 64 MiB VMEM -> bound the (tm, tn) f32 output tile
    return 512, 512       # v6e: big tiles reach ~85% of roofline


def _pick_t_chunk(seq, requested=32):
    """Pick a time-chunk size close to `requested` that minimizes padded timesteps."""
    requested = max(1, min(requested, seq))
    n_chunks = -(-seq // requested)
    return -(-seq // n_chunks)


# -----------------------------------------------------------------------------
# Recurrent kernel: h_t = tanh(x_proj_t + h_{t-1} @ W_hh^T)
#   (x_proj already contains b_ih + b_hh, and the W_ih one-hot matmul as a gather)
# -----------------------------------------------------------------------------
def _make_rnn_kernel(t_chunk, seq_len, needs_mask):
    def kernel(xp_ref, h0_ref, whh_ref, hs_ref, hT_ref):
        tblk = pl.program_id(1)  # time-chunk axis (innermost, "arbitrary")

        # Initialize the carried hidden state from the supplied initial state.
        @pl.when(tblk == 0)
        def _():
            hT_ref[...] = h0_ref[...]

        h = hT_ref[...]  # (BB, Hp) f32 carry, lives in the revisited output block
        # Fully-unrolled static loop over the timesteps of this chunk.
        for i in range(t_chunk):
            pre = xp_ref[i].astype(jnp.float32) + jnp.dot(
                h.astype(whh_ref.dtype), whh_ref[...],
                preferred_element_type=jnp.float32)
            h_new = jnp.tanh(pre)
            if needs_mask:
                # Freeze the carry on padded timesteps so hT stays correct.
                # NOTE: hs_ref still receives (stale) writes for padded steps; they are
                # sliced off via h_seq[:seq] in the wrapper — do not drop that slice.
                valid = (tblk * t_chunk + i) < seq_len
                h_new = jnp.where(valid, h_new, h)
            h = h_new
            hs_ref[i] = h.astype(hs_ref.dtype)  # bf16 slab: halves HBM writeback
        # Write the carry every chunk (robust revisited-output accumulator).
        hT_ref[...] = h

    return kernel


# -----------------------------------------------------------------------------
# Dense head: out = h @ W_dense^T + b_dense   (hoisted out of the time loop,
# M- and N-tiled so the weight / output blocks never exceed VMEM at real sizes)
# -----------------------------------------------------------------------------
def _dense_kernel(h_ref, w_ref, b_ref, o_ref):
    o_ref[...] = (jnp.dot(h_ref[...].astype(w_ref.dtype), w_ref[...],
                          preferred_element_type=jnp.float32)
                  + b_ref[...]).astype(o_ref.dtype)


def _dense_head(h_flat, w_dense, b_dense, *, tm, tn, vmem_limit):
    m, h_pad = h_flat.shape                 # hidden already padded to a multiple of 128
    vocab, hidden = w_dense.shape

    tn = min(tn, _round_up(vocab, 128))     # lane-dense N tile (multiple of 128)
    v_pad = _round_up(vocab, tn)
    tm = min(tm, _round_up(m, 8))
    m_pad = _round_up(m, tm)

    if m_pad != m:
        h_flat = jnp.pad(h_flat, ((0, m_pad - m), (0, 0)))

    wd = jnp.pad(w_dense.T.astype(COMPUTE_DTYPE),
                 ((0, h_pad - hidden), (0, v_pad - vocab)))           # (h_pad, v_pad) bf16
    bd = jnp.pad(b_dense.astype(jnp.float32), (0, v_pad - vocab)).reshape(1, v_pad)

    # NOTE: constant-index weight/bias blocks could use pipeline_mode=pl.Buffered(1)
    # to avoid double-buffering their VMEM; omitted here for lowering robustness —
    # the raised vmem_limit already provides the needed headroom.
    out = pl.pallas_call(
        _dense_kernel,
        out_shape=jax.ShapeDtypeStruct((m_pad, v_pad), jnp.float32),
        grid_spec=pltpu.PrefetchScalarGridSpec(
            num_scalar_prefetch=0,
            grid=(m_pad // tm, v_pad // tn),
            in_specs=[
                pl.BlockSpec((tm, h_pad), lambda i, j: (i, 0)),
                pl.BlockSpec((h_pad, tn), lambda i, j: (0, j)),
                pl.BlockSpec((1, tn), lambda i, j: (0, j)),
            ],
            out_specs=pl.BlockSpec((tm, tn), lambda i, j: (i, j)),
        ),
        compiler_params=pltpu.CompilerParams(
            dimension_semantics=(pltpu.PARALLEL, pltpu.PARALLEL),
            vmem_limit_bytes=vmem_limit,
        ),
    )(h_flat, wd, bd)
    return out[:m, :vocab]


# -----------------------------------------------------------------------------
# Full forward
# -----------------------------------------------------------------------------
def rnn_model_forward(inputs, state, params, *, t_chunk=None, head_tiles=None):
    """
    inputs: (batch, seq) int32 token ids
    state : (1, batch, hidden) float32
    returns (output, new_state):
       output    : (seq*batch, vocab) float32
       new_state : (1, batch, hidden) float32
    """
    w_ih, w_hh, b_ih, b_hh, w_dense, b_dense = params
    batch, seq = inputs.shape
    hidden, vocab = w_ih.shape

    kind = _device_kind()
    vmem_limit = _vmem_limit_bytes(kind)
    tm_head, tn_head = head_tiles if head_tiles is not None else _default_head_tiles(kind)

    # Lane-dense hidden: pad to a multiple of 128 (no-op for hidden=256).
    h_pad = _round_up(hidden, 128)

    # --- Input projection as a gather (replaces one_hot @ W_ih^T), biases pre-summed.
    #     Stored in bf16 to halve the per-chunk input DMA.
    tokens = inputs.T                                                     # (seq, batch)
    x_proj = (jnp.take(w_ih.T, tokens, axis=0) + (b_ih + b_hh)).astype(COMPUTE_DTYPE)

    # --- Time chunking (amortize ~0.35 us/grid-step overhead on the serial time axis)
    if t_chunk is None:
        t_chunk = _pick_t_chunk(seq, 32)
    t_chunk = max(1, min(t_chunk, seq))
    t_pad = _round_up(seq, t_chunk)
    needs_mask = (t_pad != seq)

    x_proj = jnp.pad(x_proj, ((0, t_pad - seq), (0, 0), (0, h_pad - hidden)))

    # --- Batch blocking: split only when the chip really has 2 TensorCores (v7x).
    #     bb must stay a multiple of 16 (bf16 sublane packing) or equal to batch.
    if _tensorcores_per_chip(kind) == 2 and batch >= 32 and batch % 32 == 0:
        bb = batch // 2
        batch_sem = pltpu.CORE_PARALLEL   # guarantee the split across the 2 TCs
    else:
        bb = batch                        # single block; full dim satisfies (8,128) rule
        batch_sem = pltpu.PARALLEL
    n_bblk = batch // bb

    h0 = jnp.pad(state[0].astype(jnp.float32), ((0, 0), (0, h_pad - hidden)))
    whh = jnp.pad(w_hh.T, ((0, h_pad - hidden), (0, h_pad - hidden))).astype(COMPUTE_DTYPE)

    h_seq, hT = pl.pallas_call(
        _make_rnn_kernel(t_chunk, seq, needs_mask),
        out_shape=(
            jax.ShapeDtypeStruct((t_pad, batch, h_pad), COMPUTE_DTYPE),  # bf16 h slab
            jax.ShapeDtypeStruct((batch, h_pad), jnp.float32),           # final carry
        ),
        grid_spec=pltpu.PrefetchScalarGridSpec(
            num_scalar_prefetch=0,
            grid=(n_bblk, t_pad // t_chunk),
            in_specs=[
                pl.BlockSpec((t_chunk, bb, h_pad), lambda b, t: (t, b, 0)),  # x_proj chunk
                pl.BlockSpec((bb, h_pad), lambda b, t: (b, 0)),              # h0
                pl.BlockSpec((h_pad, h_pad), lambda b, t: (0, 0)),           # W_hh^T (bf16)
            ],
            out_specs=[
                pl.BlockSpec((t_chunk, bb, h_pad), lambda b, t: (t, b, 0)),  # h per step
                pl.BlockSpec((bb, h_pad), lambda b, t: (b, 0)),              # carried h
            ],
        ),
        compiler_params=pltpu.CompilerParams(
            # batch blocks independent; time is a true recurrence -> sequential.
            dimension_semantics=(batch_sem, pltpu.ARBITRARY),
            vmem_limit_bytes=vmem_limit,
        ),
    )(x_proj, h0, whh)

    # --- Dense head hoisted out of the sequential loop: one big parallel matmul.
    #     h_seq[:seq] also drops the (stale) padded timesteps written under the mask.
    h_flat = h_seq[:seq].reshape(seq * batch, h_pad)
    output = _dense_head(h_flat, w_dense, b_dense,
                         tm=tm_head, tn=tn_head, vmem_limit=vmem_limit)

    new_state = hT[:, :hidden][None]                                     # (1, batch, hidden)
    return output, new_state


# -----------------------------------------------------------------------------
# Pure-JAX reference (f32) mirroring the PyTorch forward, for validation.
# -----------------------------------------------------------------------------
def _reference_forward(inputs, state, params):
    w_ih, w_hh, b_ih, b_hh, w_dense, b_dense = params
    vocab = w_ih.shape[1]
    x = jax.nn.one_hot(inputs.T, vocab, dtype=jnp.float32)  # (seq, batch, vocab)
    h0 = state[0]

    def step(h, x_t):
        h_new = jnp.tanh(x_t @ w_ih.T + b_ih + h @ w_hh.T + b_hh)
        return h_new, h_new

    hT, ys = lax.scan(step, h0, x)
    out = ys.reshape(-1, ys.shape[-1]) @ w_dense.T + b_dense
    return out, hT[None]


def init_params(key, vocab_size, hidden_size):
    # PyTorch nn.RNN / nn.Linear default init: U(-1/sqrt(hidden), 1/sqrt(hidden))
    k = 1.0 / jnp.sqrt(hidden_size)
    keys = jax.random.split(key, 6)
    w_ih = jax.random.uniform(keys[0], (hidden_size, vocab_size), jnp.float32, -k, k)
    w_hh = jax.random.uniform(keys[1], (hidden_size, hidden_size), jnp.float32, -k, k)
    b_ih = jax.random.uniform(keys[2], (hidden_size,), jnp.float32, -k, k)
    b_hh = jax.random.uniform(keys[3], (hidden_size,), jnp.float32, -k, k)
    w_dense = jax.random.uniform(keys[4], (vocab_size, hidden_size), jnp.float32, -k, k)
    b_dense = jax.random.uniform(keys[5], (vocab_size,), jnp.float32, -k, k)
    return (w_ih, w_hh, b_ih, b_hh, w_dense, b_dense)


if __name__ == "__main__":
    # Small shapes consistent with the module: (batch, seq) int tokens, vocab, hidden.
    batch, seq, vocab_size, hidden_size = 2, 10, 16, 32

    key = jax.random.PRNGKey(0)
    k_inp, k_state, k_param = jax.random.split(key, 3)

    inputs = jax.random.randint(k_inp, (batch, seq), 0, vocab_size, dtype=jnp.int32)
    state = jax.random.normal(k_state, (1, batch, hidden_size), dtype=jnp.float32)
    params = init_params(k_param, vocab_size, hidden_size)

    ref_out, ref_state = _reference_forward(inputs, state, params)

    # Config 1: auto t_chunk (divides seq -> no masking path).
    out, new_state = rnn_model_forward(inputs, state, params)
    out = jax.block_until_ready(out)
    new_state = jax.block_until_ready(new_state)
    assert out.shape == (seq * batch, vocab_size)
    assert new_state.shape == (1, batch, hidden_size)
    # bf16 MXU operands / bf16 slabs with f32 accumulation => loosened tolerance.
    assert jnp.allclose(out, ref_out, atol=5e-2, rtol=5e-2), \
        float(jnp.max(jnp.abs(out - ref_out)))
    assert jnp.allclose(new_state, ref_state, atol=5e-2, rtol=5e-2), \
        float(jnp.max(jnp.abs(new_state - ref_state)))

    # Config 2: t_chunk that does not divide seq -> exercises time padding + masking.
    out2, new_state2 = rnn_model_forward(inputs, state, params, t_chunk=4)
    out2 = jax.block_until_ready(out2)
    new_state2 = jax.block_until_ready(new_state2)
    assert jnp.allclose(out2, ref_out, atol=5e-2, rtol=5e-2), \
        float(jnp.max(jnp.abs(out2 - ref_out)))
    assert jnp.allclose(new_state2, ref_state, atol=5e-2, rtol=5e-2), \
        float(jnp.max(jnp.abs(new_state2 - ref_state)))

    print("KERNEL_OK")
</pallas_src>

<mosaic_0001>
module attributes {stable_mosaic.version = 11 : i64} {
  func.func @kernel(%arg0: i32, %arg1: i32, %arg2: memref<10x2x128xbf16, #tpu.memory_space<vmem>>, %arg3: memref<2x128xf32, #tpu.memory_space<vmem>>, %arg4: memref<128x128xbf16, #tpu.memory_space<vmem>>, %arg5: memref<10x2x128xbf16, #tpu.memory_space<vmem>>, %arg6: memref<2x128xf32, #tpu.memory_space<vmem>>) attributes {dimension_semantics = [#tpu.dimension_semantics<parallel>, #tpu.dimension_semantics<arbitrary>], iteration_bounds = array<i64: 1, 1>, scalar_prefetch = 0 : i64, scratch_operands = 0 : i64, tpu.core_type = #tpu.core_type<tc>, window_params = [{transform_indices = @transform_0, window_bounds = array<i64: 10, 2, 128>}, {transform_indices = @transform_1, window_bounds = array<i64: 2, 128>}, {pipeline_mode = #tpu.pipeline_mode<synchronous>, transform_indices = @transform_2, window_bounds = array<i64: 128, 128>}, {transform_indices = @transform_3, window_bounds = array<i64: 10, 2, 128>}, {transform_indices = @transform_4, window_bounds = array<i64: 2, 128>}]} {
    %c0_i32 = arith.constant 0 : i32
    %0 = arith.cmpi eq, %arg1, %c0_i32 : i32
    %1 = arith.extui %0 : i1 to i32
    %c0_i32_0 = arith.constant 0 : i32
    %2 = arith.cmpi ne, %1, %c0_i32_0 : i32
    scf.if %2 {
      %c0_84 = arith.constant 0 : index
      %c0_85 = arith.constant 0 : index
      %125 = vector.load %arg3[%c0_84, %c0_85] : memref<2x128xf32, #tpu.memory_space<vmem>>, vector<2x128xf32>
      %c0_86 = arith.constant 0 : index
      %c0_87 = arith.constant 0 : index
      %126 = vector.load %arg6[%c0_86, %c0_87] : memref<2x128xf32, #tpu.memory_space<vmem>>, vector<2x128xf32>
      tpu.vector_store %arg6[%c0_86, %c0_87], %125 {strides = array<i32>} : memref<2x128xf32, #tpu.memory_space<vmem>>, vector<2x128xf32>,
    } else {
    }
    %c0 = arith.constant 0 : index
    %c0_1 = arith.constant 0 : index
    %3 = vector.load %arg6[%c0, %c0_1] : memref<2x128xf32, #tpu.memory_space<vmem>>, vector<2x128xf32>
    %c0_2 = arith.constant 0 : index
    %c0_3 = arith.constant 0 : index
    %c0_4 = arith.constant 0 : index
    %4 = vector.load %arg2[%c0_2, %c0_3, %c0_4] : memref<10x2x128xbf16, #tpu.memory_space<vmem>>, vector<1x2x128xbf16>
    %5 = vector.shape_cast %4 : vector<1x2x128xbf16> to vector<2x128xbf16>
    %6 = arith.extf %5 : vector<2x128xbf16> to vector<2x128xf32>
    %7 = arith.truncf %3 : vector<2x128xf32> to vector<2x128xbf16>
    %c0_5 = arith.constant 0 : index
    %c0_6 = arith.constant 0 : index
    %8 = vector.load %arg4[%c0_5, %c0_6] : memref<128x128xbf16, #tpu.memory_space<vmem>>, vector<128x128xbf16>
    %cst = arith.constant dense<0.000000e+00> : vector<2x128xf32>
    %9 = tpu.matmul %7, %8, %cst {dimension_numbers = #tpu.dot_dimension_numbers<[1], [0], [0], [1], [0, 0, 1, 1], [], []>} : vector<2x128xbf16>, vector<128x128xbf16>, vector<2x128xf32> -> vector<2x128xf32>
    %10 = arith.addf %6, %9 : vector<2x128xf32>
    %11 = math.tanh %10 : vector<2x128xf32>
    %12 = arith.truncf %11 : vector<2x128xf32> to vector<2x128xbf16>
    %c0_7 = arith.constant 0 : index
    %c0_8 = arith.constant 0 : index
    %c0_9 = arith.constant 0 : index
    %13 = vector.load %arg5[%c0_7, %c0_8, %c0_9] : memref<10x2x128xbf16, #tpu.memory_space<vmem>>, vector<1x2x128xbf16>
    %14 = vector.shape_cast %13 : vector<1x2x128xbf16> to vector<2x128xbf16>
    %15 = vector.shape_cast %12 : vector<2x128xbf16> to vector<1x2x128xbf16>
    tpu.vector_store %arg5[%c0_7, %c0_8, %c0_9], %15 {strides = array<i32>} : memref<10x2x128xbf16, #tpu.memory_space<vmem>>, vector<1x2x128xbf16>,
    %c1 = arith.constant 1 : index
    %c0_10 = arith.constant 0 : index
    %c0_11 = arith.constant 0 : index
    %16 = vector.load %arg2[%c1, %c0_10, %c0_11] : memref<10x2x128xbf16, #tpu.memory_space<vmem>>, vector<1x2x128xbf16>
    %17 = vector.shape_cast %16 : vector<1x2x128xbf16> to vector<2x128xbf16>
    %18 = arith.extf %17 : vector<2x128xbf16> to vector<2x128xf32>
    %19 = arith.truncf %11 : vector<2x128xf32> to vector<2x128xbf16>
    %c0_12 = arith.constant 0 : index
    %c0_13 = arith.constant 0 : index
    %20 = vector.load %arg4[%c0_12, %c0_13] : memref<128x128xbf16, #tpu.memory_space<vmem>>, vector<128x128xbf16>
    %cst_14 = arith.constant dense<0.000000e+00> : vector<2x128xf32>
    %21 = tpu.matmul %19, %20, %cst_14 {dimension_numbers = #tpu.dot_dimension_numbers<[1], [0], [0], [1], [0, 0, 1, 1], [], []>} : vector<2x128xbf16>, vector<128x128xbf16>, vector<2x128xf32> -> vector<2x128xf32>
    %22 = arith.addf %18, %21 : vector<2x128xf32>
    %23 = math.tanh %22 : vector<2x128xf32>
    %24 = arith.truncf %23 : vector<2x128xf32> to vector<2x128xbf16>
    %c1_15 = arith.constant 1 : index
    %c0_16 = arith.constant 0 : index
    %c0_17 = arith.constant 0 : index
    %25 = vector.load %arg5[%c1_15, %c0_16, %c0_17] : memref<10x2x128xbf16, #tpu.memory_space<vmem>>, vector<1x2x128xbf16>
    %26 = vector.shape_cast %25 : vector<1x2x128xbf16> to vector<2x128xbf16>
    %27 = vector.shape_cast %24 : vector<2x128xbf16> to vector<1x2x128xbf16>
    tpu.vector_store %arg5[%c1_15, %c0_16, %c0_17], %27 {strides = array<i32>} : memref<10x2x128xbf16, #tpu.memory_space<vmem>>, vector<1x2x128xbf16>,
    %c2 = arith.constant 2 : index
    %c0_18 = arith.constant 0 : index
    %c0_19 = arith.constant 0 : index
    %28 = vector.load %arg2[%c2, %c0_18, %c0_19] : memref<10x2x128xbf16, #tpu.memory_space<vmem>>, vector<1x2x128xbf16>
    %29 = vector.shape_cast %28 : vector<1x2x128xbf16> to vector<2x128xbf16>
    %30 = arith.extf %29 : vector<2x128xbf16> to vector<2x128xf32>
    %31 = arith.truncf %23 : vector<2x128xf32> to vector<2x128xbf16>
    %c0_20 = arith.constant 0 : index
    %c0_21 = arith.constant 0 : index
    %32 = vector.load %arg4[%c0_20, %c0_21] : memref<128x128xbf16, #tpu.memory_space<vmem>>, vector<128x128xbf16>
    %cst_22 = arith.constant dense<0.000000e+00> : vector<2x128xf32>
    %33 = tpu.matmul %31, %32, %cst_22 {dimension_numbers = #tpu.dot_dimension_numbers<[1], [0], [0], [1], [0, 0, 1, 1], [], []>} : vector<2x128xbf16>, vector<128x128xbf16>, vector<2x128xf32> -> vector<2x128xf32>
    %34 = arith.addf %30, %33 : vector<2x128xf32>
    %35 = math.tanh %34 : vector<2x128xf32>
    %36 = arith.truncf %35 : vector<2x128xf32> to vector<2x128xbf16>
    %c2_23 = arith.constant 2 : index
    %c0_24 = arith.constant 0 : index
    %c0_25 = arith.constant 0 : index
    %37 = vector.load %arg5[%c2_23, %c0_24, %c0_25] : memref<10x2x128xbf16, #tpu.memory_space<vmem>>, vector<1x2x128xbf16>
    %38 = vector.shape_cast %37 : vector<1x2x128xbf16> to vector<2x128xbf16>
    %39 = vector.shape_cast %36 : vector<2x128xbf16> to vector<1x2x128xbf16>
    tpu.vector_store %arg5[%c2_23, %c0_24, %c0_25], %39 {strides = array<i32>} : memref<10x2x128xbf16, #tpu.memory_space<vmem>>, vector<1x2x128xbf16>,
    %c3 = arith.constant 3 : index
    %c0_26 = arith.constant 0 : index
    %c0_27 = arith.constant 0 : index
    %40 = vector.load %arg2[%c3, %c0_26, %c0_27] : memref<10x2x128xbf16, #tpu.memory_space<vmem>>, vector<1x2x128xbf16>
    %41 = vector.shape_cast %40 : vector<1x2x128xbf16> to vector<2x128xbf16>
    %42 = arith.extf %41 : vector<2x128xbf16> to vector<2x128xf32>
    %43 = arith.truncf %35 : vector<2x128xf32> to vector<2x128xbf16>
    %c0_28 = arith.constant 0 : index
    %c0_29 = arith.constant 0 : index
    %44 = vector.load %arg4[%c0_28, %c0_29] : memref<128x128xbf16, #tpu.memory_space<vmem>>, vector<128x128xbf16>
    %cst_30 = arith.constant dense<0.000000e+00> : vector<2x128xf32>
    %45 = tpu.matmul %43, %44, %cst_30 {dimension_numbers = #tpu.dot_dimension_numbers<[1], [0], [0], [1], [0, 0, 1, 1], [], []>} : vector<2x128xbf16>, vector<128x128xbf16>, vector<2x128xf32> -> vector<2x128xf32>
    %46 = arith.addf %42, %45 : vector<2x128xf32>
    %47 = math.tanh %46 : vector<2x128xf32>
    %48 = arith.truncf %47 : vector<2x128xf32> to vector<2x128xbf16>
    %c3_31 = arith.constant 3 : index
    %c0_32 = arith.constant 0 : index
    %c0_33 = arith.constant 0 : index
    %49 = vector.load %arg5[%c3_31, %c0_32, %c0_33] : memref<10x2x128xbf16, #tpu.memory_space<vmem>>, vector<1x2x128xbf16>
    %50 = vector.shape_cast %49 : vector<1x2x128xbf16> to vector<2x128xbf16>
    %51 = vector.shape_cast %48 : vector<2x128xbf16> to vector<1x2x128xbf16>
    tpu.vector_store %arg5[%c3_31, %c0_32, %c0_33], %51 {strides = array<i32>} : memref<10x2x128xbf16, #tpu.memory_space<vmem>>, vector<1x2x128xbf16>,
    %c4 = arith.constant 4 : index
    %c0_34 = arith.constant 0 : index
    %c0_35 = arith.constant 0 : index
    %52 = vector.load %arg2[%c4, %c0_34, %c0_35] : memref<10x2x128xbf16, #tpu.memory_space<vmem>>, vector<1x2x128xbf16>
    %53 = vector.shape_cast %52 : vector<1x2x128xbf16> to vector<2x128xbf16>
    %54 = arith.extf %53 : vector<2x128xbf16> to vector<2x128xf32>
    %55 = arith.truncf %47 : vector<2x128xf32> to vector<2x128xbf16>
    %c0_36 = arith.constant 0 : index
    %c0_37 = arith.constant 0 : index
    %56 = vector.load %arg4[%c0_36, %c0_37] : memref<128x128xbf16, #tpu.memory_space<vmem>>, vector<128x128xbf16>
    %cst_38 = arith.constant dense<0.000000e+00> : vector<2x128xf32>
    %57 = tpu.matmul %55, %56, %cst_38 {dimension_numbers = #tpu.dot_dimension_numbers<[1], [0], [0], [1], [0, 0, 1, 1], [], []>} : vector<2x128xbf16>, vector<128x128xbf16>, vector<2x128xf32> -> vector<2x128xf32>
    %58 = arith.addf %54, %57 : vector<2x128xf32>
    %59 = math.tanh %58 : vector<2x128xf32>
    %60 = arith.truncf %59 : vector<2x128xf32> to vector<2x128xbf16>
    %c4_39 = arith.constant 4 : index
    %c0_40 = arith.constant 0 : index
    %c0_41 = arith.constant 0 : index
    %61 = vector.load %arg5[%c4_39, %c0_40, %c0_41] : memref<10x2x128xbf16, #tpu.memory_space<vmem>>, vector<1x2x128xbf16>
    %62 = vector.shape_cast %61 : vector<1x2x128xbf16> to vector<2x128xbf16>
    %63 = vector.shape_cast %60 : vector<2x128xbf16> to vector<1x2x128xbf16>
    tpu.vector_store %arg5[%c4_39, %c0_40, %c0_41], %63 {strides = array<i32>} : memref<10x2x128xbf16, #tpu.memory_space<vmem>>, vector<1x2x128xbf16>,
    %c5 = arith.constant 5 : index
    %c0_42 = arith.constant 0 : index
    %c0_43 = arith.constant 0 : index
    %64 = vector.load %arg2[%c5, %c0_42, %c0_43] : memref<10x2x128xbf16, #tpu.memory_space<vmem>>, vector<1x2x128xbf16>
    %65 = vector.shape_cast %64 : vector<1x2x128xbf16> to vector<2x128xbf16>
    %66 = arith.extf %65 : vector<2x128xbf16> to vector<2x128xf32>
    %67 = arith.truncf %59 : vector<2x128xf32> to vector<2x128xbf16>
    %c0_44 = arith.constant 0 : index
    %c0_45 = arith.constant 0 : index
    %68 = vector.load %arg4[%c0_44, %c0_45] : memref<128x128xbf16, #tpu.memory_space<vmem>>, vector<128x128xbf16>
    %cst_46 = arith.constant dense<0.000000e+00> : vector<2x128xf32>
    %69 = tpu.matmul %67, %68, %cst_46 {dimension_numbers = #tpu.dot_dimension_numbers<[1], [0], [0], [1], [0, 0, 1, 1], [], []>} : vector<2x128xbf16>, vector<128x128xbf16>, vector<2x128xf32> -> vector<2x128xf32>
    %70 = arith.addf %66, %69 : vector<2x128xf32>
    %71 = math.tanh %70 : vector<2x128xf32>
    %72 = arith.truncf %71 : vector<2x128xf32> to vector<2x128xbf16>
    %c5_47 = arith.constant 5 : index
    %c0_48 = arith.constant 0 : index
    %c0_49 = arith.constant 0 : index
    %73 = vector.load %arg5[%c5_47, %c0_48, %c0_49] : memref<10x2x128xbf16, #tpu.memory_space<vmem>>, vector<1x2x128xbf16>
    %74 = vector.shape_cast %73 : vector<1x2x128xbf16> to vector<2x128xbf16>
    %75 = vector.shape_cast %72 : vector<2x128xbf16> to vector<1x2x128xbf16>
    tpu.vector_store %arg5[%c5_47, %c0_48, %c0_49], %75 {strides = array<i32>} : memref<10x2x128xbf16, #tpu.memory_space<vmem>>, vector<1x2x128xbf16>,
    %c6 = arith.constant 6 : index
    %c0_50 = arith.constant 0 : index
    %c0_51 = arith.constant 0 : index
    %76 = vector.load %arg2[%c6, %c0_50, %c0_51] : memref<10x2x128xbf16, #tpu.memory_space<vmem>>, vector<1x2x128xbf16>
    %77 = vector.shape_cast %76 : vector<1x2x128xbf16> to vector<2x128xbf16>
    %78 = arith.extf %77 : vector<2x128xbf16> to vector<2x128xf32>
    %79 = arith.truncf %71 : vector<2x128xf32> to vector<2x128xbf16>
    %c0_52 = arith.constant 0 : index
    %c0_53 = arith.constant 0 : index
    %80 = vector.load %arg4[%c0_52, %c0_53] : memref<128x128xbf16, #tpu.memory_space<vmem>>, vector<128x128xbf16>
    %cst_54 = arith.constant dense<0.000000e+00> : vector<2x128xf32>
    %81 = tpu.matmul %79, %80, %cst_54 {dimension_numbers = #tpu.dot_dimension_numbers<[1], [0], [0], [1], [0, 0, 1, 1], [], []>} : vector<2x128xbf16>, vector<128x128xbf16>, vector<2x128xf32> -> vector<2x128xf32>
    %82 = arith.addf %78, %81 : vector<2x128xf32>
    %83 = math.tanh %82 : vector<2x128xf32>
    %84 = arith.truncf %83 : vector<2x128xf32> to vector<2x128xbf16>
    %c6_55 = arith.constant 6 : index
    %c0_56 = arith.constant 0 : index
    %c0_57 = arith.constant 0 : index
    %85 = vector.load %arg5[%c6_55, %c0_56, %c0_57] : memref<10x2x128xbf16, #tpu.memory_space<vmem>>, vector<1x2x128xbf16>
    %86 = vector.shape_cast %85 : vector<1x2x128xbf16> to vector<2x128xbf16>
    %87 = vector.shape_cast %84 : vector<2x128xbf16> to vector<1x2x128xbf16>
    tpu.vector_store %arg5[%c6_55, %c0_56, %c0_57], %87 {strides = array<i32>} : memref<10x2x128xbf16, #tpu.memory_space<vmem>>, vector<1x2x128xbf16>,
    %c7 = arith.constant 7 : index
    %c0_58 = arith.constant 0 : index
    %c0_59 = arith.constant 0 : index
    %88 = vector.load %arg2[%c7, %c0_58, %c0_59] : memref<10x2x128xbf16, #tpu.memory_space<vmem>>, vector<1x2x128xbf16>
    %89 = vector.shape_cast %88 : vector<1x2x128xbf16> to vector<2x128xbf16>
    %90 = arith.extf %89 : vector<2x128xbf16> to vector<2x128xf32>
    %91 = arith.truncf %83 : vector<2x128xf32> to vector<2x128xbf16>
    %c0_60 = arith.constant 0 : index
    %c0_61 = arith.constant 0 : index
    %92 = vector.load %arg4[%c0_60, %c0_61] : memref<128x128xbf16, #tpu.memory_space<vmem>>, vector<128x128xbf16>
    %cst_62 = arith.constant dense<0.000000e+00> : vector<2x128xf32>
    %93 = tpu.matmul %91, %92, %cst_62 {dimension_numbers = #tpu.dot_dimension_numbers<[1], [0], [0], [1], [0, 0, 1, 1], [], []>} : vector<2x128xbf16>, vector<128x128xbf16>, vector<2x128xf32> -> vector<2x128xf32>
    %94 = arith.addf %90, %93 : vector<2x128xf32>
    %95 = math.tanh %94 : vector<2x128xf32>
    %96 = arith.truncf %95 : vector<2x128xf32> to vector<2x128xbf16>
    %c7_63 = arith.constant 7 : index
    %c0_64 = arith.constant 0 : index
    %c0_65 = arith.constant 0 : index
    %97 = vector.load %arg5[%c7_63, %c0_64, %c0_65] : memref<10x2x128xbf16, #tpu.memory_space<vmem>>, vector<1x2x128xbf16>
    %98 = vector.shape_cast %97 : vector<1x2x128xbf16> to vector<2x128xbf16>
    %99 = vector.shape_cast %96 : vector<2x128xbf16> to vector<1x2x128xbf16>
    tpu.vector_store %arg5[%c7_63, %c0_64, %c0_65], %99 {strides = array<i32>} : memref<10x2x128xbf16, #tpu.memory_space<vmem>>, vector<1x2x128xbf16>,
    %c8 = arith.constant 8 : index
    %c0_66 = arith.constant 0 : index
    %c0_67 = arith.constant 0 : index
    %100 = vector.load %arg2[%c8, %c0_66, %c0_67] : memref<10x2x128xbf16, #tpu.memory_space<vmem>>, vector<1x2x128xbf16>
    %101 = vector.shape_cast %100 : vector<1x2x128xbf16> to vector<2x128xbf16>
    %102 = arith.extf %101 : vector<2x128xbf16> to vector<2x128xf32>
    %103 = arith.truncf %95 : vector<2x128xf32> to vector<2x128xbf16>
    %c0_68 = arith.constant 0 : index
    %c0_69 = arith.constant 0 : index
    %104 = vector.load %arg4[%c0_68, %c0_69] : memref<128x128xbf16, #tpu.memory_space<vmem>>, vector<128x128xbf16>
    %cst_70 = arith.constant dense<0.000000e+00> : vector<2x128xf32>
    %105 = tpu.matmul %103, %104, %cst_70 {dimension_numbers = #tpu.dot_dimension_numbers<[1], [0], [0], [1], [0, 0, 1, 1], [], []>} : vector<2x128xbf16>, vector<128x128xbf16>, vector<2x128xf32> -> vector<2x128xf32>
    %106 = arith.addf %102, %105 : vector<2x128xf32>
    %107 = math.tanh %106 : vector<2x128xf32>
    %108 = arith.truncf %107 : vector<2x128xf32> to vector<2x128xbf16>
    %c8_71 = arith.constant 8 : index
    %c0_72 = arith.constant 0 : index
    %c0_73 = arith.constant 0 : index
    %109 = vector.load %arg5[%c8_71, %c0_72, %c0_73] : memref<10x2x128xbf16, #tpu.memory_space<vmem>>, vector<1x2x128xbf16>
    %110 = vector.shape_cast %109 : vector<1x2x128xbf16> to vector<2x128xbf16>
    %111 = vector.shape_cast %108 : vector<2x128xbf16> to vector<1x2x128xbf16>
    tpu.vector_store %arg5[%c8_71, %c0_72, %c0_73], %111 {strides = array<i32>} : memref<10x2x128xbf16, #tpu.memory_space<vmem>>, vector<1x2x128xbf16>,
    %c9 = arith.constant 9 : index
    %c0_74 = arith.constant 0 : index
    %c0_75 = arith.constant 0 : index
    %112 = vector.load %arg2[%c9, %c0_74, %c0_75] : memref<10x2x128xbf16, #tpu.memory_space<vmem>>, vector<1x2x128xbf16>
    %113 = vector.shape_cast %112 : vector<1x2x128xbf16> to vector<2x128xbf16>
    %114 = arith.extf %113 : vector<2x128xbf16> to vector<2x128xf32>
    %115 = arith.truncf %107 : vector<2x128xf32> to vector<2x128xbf16>
    %c0_76 = arith.constant 0 : index
    %c0_77 = arith.constant 0 : index
    %116 = vector.load %arg4[%c0_76, %c0_77] : memref<128x128xbf16, #tpu.memory_space<vmem>>, vector<128x128xbf16>
    %cst_78 = arith.constant dense<0.000000e+00> : vector<2x128xf32>
    %117 = tpu.matmul %115, %116, %cst_78 {dimension_numbers = #tpu.dot_dimension_numbers<[1], [0], [0], [1], [0, 0, 1, 1], [], []>} : vector<2x128xbf16>, vector<128x128xbf16>, vector<2x128xf32> -> vector<2x128xf32>
    %118 = arith.addf %114, %117 : vector<2x128xf32>
    %119 = math.tanh %118 : vector<2x128xf32>
    %120 = arith.truncf %119 : vector<2x128xf32> to vector<2x128xbf16>
    %c9_79 = arith.constant 9 : index
    %c0_80 = arith.constant 0 : index
    %c0_81 = arith.constant 0 : index
    %121 = vector.load %arg5[%c9_79, %c0_80, %c0_81] : memref<10x2x128xbf16, #tpu.memory_space<vmem>>, vector<1x2x128xbf16>
    %122 = vector.shape_cast %121 : vector<1x2x128xbf16> to vector<2x128xbf16>
    %123 = vector.shape_cast %120 : vector<2x128xbf16> to vector<1x2x128xbf16>
    tpu.vector_store %arg5[%c9_79, %c0_80, %c0_81], %123 {strides = array<i32>} : memref<10x2x128xbf16, #tpu.memory_space<vmem>>, vector<1x2x128xbf16>,
    %c0_82 = arith.constant 0 : index
    %c0_83 = arith.constant 0 : index
    %124 = vector.load %arg6[%c0_82, %c0_83] : memref<2x128xf32, #tpu.memory_space<vmem>>, vector<2x128xf32>
    tpu.vector_store %arg6[%c0_82, %c0_83], %119 {strides = array<i32>} : memref<2x128xf32, #tpu.memory_space<vmem>>, vector<2x128xf32>,
    return
  }
  func.func @transform_0(%arg0: i32, %arg1: i32) -> (i32, i32, i32) {
    %c0_i32 = arith.constant 0 : i32
    %c0_i32_0 = arith.constant 0 : i32
    return %arg1, %arg0, %c0_i32 : i32, i32, i32
  }
  func.func @transform_1(%arg0: i32, %arg1: i32) -> (i32, i32) {
    %c0_i32 = arith.constant 0 : i32
    %c0_i32_0 = arith.constant 0 : i32
    return %arg0, %c0_i32 : i32, i32
  }
  func.func @transform_2(%arg0: i32, %arg1: i32) -> (i32, i32) {
    %c0_i32 = arith.constant 0 : i32
    %c0_i32_0 = arith.constant 0 : i32
    %c0_i32_1 = arith.constant 0 : i32
    return %c0_i32, %c0_i32_0 : i32, i32
  }
  func.func @transform_3(%arg0: i32, %arg1: i32) -> (i32, i32, i32) {
    %c0_i32 = arith.constant 0 : i32
    %c0_i32_0 = arith.constant 0 : i32
    return %arg1, %arg0, %c0_i32 : i32, i32, i32
  }
  func.func @transform_4(%arg0: i32, %arg1: i32) -> (i32, i32) {
    %c0_i32 = arith.constant 0 : i32
    %c0_i32_0 = arith.constant 0 : i32
    return %arg0, %c0_i32 : i32, i32
  }
}

</mosaic_0001>

<bundles_post_ra>
// kernel: tpu_custom_call.1
= control target key start
LH: loop header
LB: loop body
LE: loop exit
PB: predicated region body
PF: predicated region fallthrough
CT: control target
= control target key end

     0   :  { %10 = vsyncpa [#allocation3], 0  ;;  %s1963_s0 = inlined_call_operand.hbm [shape: bf16[10,2,128], index: 0, kind: input, shape index: {}]   ;;  %s1964_s1 = inlined_call_operand.hbm [shape: f32[2,128], index: 1, kind: input, shape index: {}]   ;;  %s1965_s2 = inlined_call_operand.hbm [shape: bf16[128,128], index: 2, kind: input, shape index: {}]   ;;  %s1966_s3 = inlined_call_operand.hbm [shape: bf16[10,2,128], index: 3, kind: output, shape index: {0}]   ;;  %s1967_s4 = inlined_call_operand.hbm [shape: f32[2,128], index: 4, kind: output, shape index: {1}]  }
   0x1   :  { %11 = vsyncpa [#allocation6], 0 }
   0x2   :  { %12 = vsyncpa [#allocation4], 0 }
   0x3   :  { %13 = vsyncpa [#allocation10], 0  ;;  %s1806_s15 = smov [#allocation5]   ;;  %s1807_s17 = smov [#allocation2]  }
   0x4   :  { %s32_s16 = sshll.u32 %s1806_s15, 4  ;;  %s19_s18 = sshll.u32 %s1807_s17, 4  ;;  %s33_s16 = int_to_ptr.vmem [resolvable:$true] %s32_s16  ;;  %s20_s18 = int_to_ptr.vmem [resolvable:$true] %s19_s18 }
   0x5   :  { %s1706_s19 = scalar_lea.vmem %s33_s16, 32  ;;  %p1711_p1 = scmp.lt.s32.totalorder %s33_s16, %s33_s16 }
   0x6   :  { %p1707_p0 = scmp.ne.s32.totalorder %s33_s16, %s1706_s19  ;;  %p1712_p2 = scmp.lt.s32.totalorder %s1706_s19, %s1706_s19 }
   0x8   :  { %p1713_p3 = por %p1712_p2, %p1711_p1 }
   0xa   :  { %p1714_p4 = pnand %p1713_p3, %p1707_p0 }
   0xc   :  { %1717 = shalt.err (!%p1714_p4)
}
   0xd   :  { %35 = dma.hbm_to_vmem [thread:$0]  %s1964_s1, 32, %s33_s16, [#allocation6]  }
   0xe   :  { %s1726_s22 = scalar_lea.vmem %s20_s18, 160  ;;  %p1731_p6 = scmp.lt.s32.totalorder %s20_s18, %s20_s18 }
   0xf   :  { %p1727_p5 = scmp.ne.s32.totalorder %s20_s18, %s1726_s22  ;;  %p1732_p7 = scmp.lt.s32.totalorder %s1726_s22, %s1726_s22 }
  0x11   :  { %p1733_p8 = por %p1732_p7, %p1731_p6 }
  0x13   :  { %p1734_p9 = pnand %p1733_p8, %p1727_p5 }
  0x15   :  { %1737 = shalt.err (!%p1734_p9)
}
  0x16   :  { %s1808_s23 = smov 16   ;;  %s1809_s24 = smov 1  }
  0x17   :  { %25 = dma.hbm_to_vmem [thread:$0]  %s1963_s0, 160, %s20_s18, [#allocation3], %s1808_s23, %s1808_s23, %s1809_s24  }
  0x18   :  { %s1810_s27 = smov [#allocation7]  }
  0x19   :  { %s41_s28 = sshll.u32 %s1810_s27, 4  ;;  %s42_s28 = int_to_ptr.vmem [resolvable:$true] %s41_s28 }
  0x1a   :  { %s1746_s1 = scalar_lea.vmem %s42_s28, 1024  ;;  %p1751_p11 = scmp.lt.s32.totalorder %s42_s28, %s42_s28 }
  0x1b   :  { %p1747_p10 = scmp.ne.s32.totalorder %s42_s28, %s1746_s1  ;;  %p1752_p12 = scmp.lt.s32.totalorder %s1746_s1, %s1746_s1 }
  0x1d   :  { %p1753_p13 = por %p1752_p12, %p1751_p11 }
  0x1f   :  { %p1754_p0 = pnand %p1753_p13, %p1747_p10 }
  0x21   :  { %1757 = shalt.err (!%p1754_p0)
}
  0x22   :  { %s1811_s29 = smov 64   ;;  %s1812_s30 = smov 4  }
  0x23   :  { %47 = dma.hbm_to_vmem [thread:$0]  %s1965_s2, 1024, %s42_s28, [#allocation6], %s1811_s29, %s1811_s29, %s1812_s30  }
  0x24   :  { %1798 = dma.done.wait [#allocation3], 160  }
  0x25   :  { %1799 = vsyncadd [#allocation3], 4294967136 }
  0x26   :  { %1800 = dma.done.wait [#allocation6], 1056  }
  0x27   :  { %1801 = vsyncadd [#allocation6], 4294966240  ;;  %v1813_v0 = vmov 0.0   ;;  %vm1814_vm0 = vmmov 0   ;;  %v1598_v1 = vld [vmem:[#allocation7 + $0x38] sm:$0xff]   ;;  %v1599_v2 = vld [vmem:[#allocation7 + $0x30] sm:$0xff]  }
  0x28   :  { %1387 = vmatprep.subr.bf16.mxu0 %v1813_v0  ;;  %1403 = vmatprep.mubr.msk.bf16.mxu0 %vm1814_vm0, %v1813_v0  ;;  %v1600_v3 = vld [vmem:[#allocation7 + $0x28] sm:$0xff]   ;;  %v62_v4 = vld [vmem:[#allocation5] sm:$0x3]  ;;  %v1601_v6 = vld [vmem:[#allocation7 + $0x20] sm:$0xff]   ;;  %s1815_s0 = smov [#allocation9]   ;;  %s1816_s7 = smov [#allocation8]  }
  0x29   :  { %1407 = vmatprep.subr.bf16.mxu1 %v1813_v0  ;;  %1423 = vmatprep.mubr.msk.bf16.mxu1 %vm1814_vm0, %v1813_v0  ;;  %63 = vst [vmem:[#allocation9] sm:$0x3] %v62_v4  ;;  %v1606_v5 = vld [vmem:[#allocation7 + $0x38] sm:$0xff]   ;;  %v1607_v7 = vld [vmem:[#allocation7 + $0x30] sm:$0xff]   ;;  %v1608_v9 = vld [vmem:[#allocation7 + $0x28] sm:$0xff]   ;;  %s1203_s2 = sshll.u32 %s1815_s0, 4  ;;  %s1204_s2 = int_to_ptr.vmem [resolvable:$true] %s1203_s2 }
  0x2a   :  { %1388 = vmatpush3.bf16.msra.mxu0 %v1598_v1  ;;  %1408 = vmatpush3.bf16.msra.mxu1 %v1606_v5  ;;  %v1602_v8 = vld [vmem:[#allocation7 + $0x18] sm:$0xff]   ;;  %v1603_v10 = vld [vmem:[#allocation7 + $0x10] sm:$0xff]   ;;  %v1604_v11 = vld [vmem:[#allocation7 + $0x8] sm:$0xff]   ;;  %s1190_s8 = sshll.u32 %s1816_s7, 4  ;;  %s1758_s9 = scalar_lea.vmem %s1204_s2, 32  ;;  %s1191_s8 = int_to_ptr.vmem [resolvable:$true] %s1190_s8 }
  0x2b   :  { %1389 = vmatprep.subr.bf16.mxu0 %v1813_v0  ;;  %1409 = vmatprep.subr.bf16.mxu1 %v1813_v0  ;;  %v1605_v12 = vld [vmem:[#allocation7] sm:$0xff]   ;;  %v1610_v16 = vld [vmem:[#allocation7 + $0x18] sm:$0xff]   ;;  %v1611_v17 = vld [vmem:[#allocation7 + $0x10] sm:$0xff]   ;;  %p1759_p1 = scmp.ne.s32.totalorder %s1204_s2, %s1758_s9  ;;  %p1763_p2 = scmp.lt.s32.totalorder %s1204_s2, %s1204_s2 }
  0x2c   :  { %v1609_v15 = vld [vmem:[#allocation7 + $0x20] sm:$0xff]   ;;  %v1612_v18 = vld [vmem:[#allocation7 + $0x8] sm:$0xff]   ;;  %v1614_v20 = vld [vmem:[#allocation7 + $0x38] sm:$0xff]   ;;  %p1764_p3 = scmp.lt.s32.totalorder %s1758_s9, %s1758_s9 }
  0x2d   :  { %v1613_v19 = vld [vmem:[#allocation7] sm:$0xff]   ;;  %v1615_v21 = vld [vmem:[#allocation7 + $0x30] sm:$0xff]   ;;  %v1616_v22 = vld [vmem:[#allocation7 + $0x28] sm:$0xff]  }
  0x2e   :  { %1390 = vmatpush3.bf16.msra.mxu0 %v1599_v2  ;;  %1410 = vmatpush3.bf16.msra.mxu1 %v1607_v7  ;;  %v65_v23 = vld [vmem:[#allocation2] sm:$0x1]  ;;  %v1617_v32 = vld [vmem:[#allocation7 + $0x20] sm:$0xff]   ;;  %v1618_v33 = vld [vmem:[#allocation7 + $0x18] sm:$0xff]   ;;  %p1765_p4 = por %p1764_p3, %p1763_p2 }
  0x2f   :  { %1391 = vmatprep.subr.bf16.mxu0 %v1813_v0  ;;  %1411 = vmatprep.subr.bf16.mxu1 %v1813_v0  ;;  %v66_v24 = vunpack.c.l.bf16 %v65_v23  ;;  %v1619_v34 = vld [vmem:[#allocation7 + $0x10] sm:$0xff]   ;;  %v1620_v35 = vld [vmem:[#allocation7 + $0x8] sm:$0xff]   ;;  %v1621_v36 = vld [vmem:[#allocation7] sm:$0xff]  }
  0x30   :  { %v64_v13 = vld [vmem:[#allocation9] sm:$0x3]  ;;  %v1622_v37 = vld [vmem:[#allocation7 + $0x38] sm:$0xff]   ;;  %v1623_v38 = vld [vmem:[#allocation7 + $0x30] sm:$0xff]   ;;  %p1766_p5 = pnand %p1765_p4, %p1759_p1 }
  0x31   :  { %v67_v14 = vpack.c.bf16 %v64_v13, %v64_v13  ;;  %v1624_v39 = vld [vmem:[#allocation7 + $0x28] sm:$0xff]   ;;  %v177_v40 = vld [vmem:[#allocation2 + $0x1] sm:$0x1]  ;;  %v1625_v49 = vld [vmem:[#allocation7 + $0x20] sm:$0xff]  }
  0x32   :  { %1392 = vmatpush3.bf16.msra.mxu0 %v1600_v3  ;;  %1412 = vmatpush3.bf16.msra.mxu1 %v1608_v9  ;;  %v178_v41 = vunpack.c.l.bf16 %v177_v40  ;;  %v1626_v50 = vld [vmem:[#allocation7 + $0x18] sm:$0xff]   ;;  %v1627_v51 = vld [vmem:[#allocation7 + $0x10] sm:$0xff]   ;;  %v1628_v52 = vld [vmem:[#allocation7 + $0x8] sm:$0xff]  }
  0x33   :  { %1393 = vmatprep.subr.bf16.mxu0 %v1813_v0  ;;  %1413 = vmatprep.subr.bf16.mxu1 %v1813_v0  ;;  %v1629_v53 = vld [vmem:[#allocation7] sm:$0xff]   ;;  %v1630_v54 = vld [vmem:[#allocation7 + $0x38] sm:$0xff]   ;;  %v1631_v55 = vld [vmem:[#allocation7 + $0x30] sm:$0xff]  }
  0x34   :  { %v1632_v56 = vld [vmem:[#allocation7 + $0x28] sm:$0xff]   ;;  %v289_v57 = vld [vmem:[#allocation2 + $0x2] sm:$0x1]  ;;  %v1633_v3 = vld [vmem:[#allocation7 + $0x20] sm:$0xff]  }
  0x35   :  { %v290_v58 = vunpack.c.l.bf16 %v289_v57  ;;  %v1634_v4 = vld [vmem:[#allocation7 + $0x18] sm:$0xff]   ;;  %v1635_v5 = vld [vmem:[#allocation7 + $0x10] sm:$0xff]   ;;  %v1637_v7 = vld [vmem:[#allocation7] sm:$0xff]  }
  0x36   :  { %1394 = vmatpush3.bf16.msra.mxu0 %v1601_v6  ;;  %1414 = vmatpush3.bf16.msra.mxu1 %v1609_v15  ;;  %v1636_v6 = vld [vmem:[#allocation7 + $0x8] sm:$0xff]   ;;  %v1639_v9 = vld [vmem:[#allocation7 + $0x30] sm:$0xff]  }
  0x37   :  { %1395 = vmatprep.subr.bf16.mxu0 %v1813_v0  ;;  %1415 = vmatprep.subr.bf16.mxu1 %v1813_v0  ;;  %v1644_v23 = vld [vmem:[#allocation7 + $0x8] sm:$0xff]  }
  0x38   :  { %v1652_v40 = vld [vmem:[#allocation7 + $0x8] sm:$0xff]  }
  0x39   :  { %v1660_v57 = vld [vmem:[#allocation7 + $0x8] sm:$0xff]  }
  0x3a   :  { %1396 = vmatpush3.bf16.msra.mxu0 %v1602_v8  ;;  %1416 = vmatpush3.bf16.msra.mxu1 %v1610_v16  ;;  %v1638_v8 = vld [vmem:[#allocation7 + $0x38] sm:$0xff]  }
  0x3b   :  { %1397 = vmatprep.subr.bf16.mxu0 %v1813_v0  ;;  %1417 = vmatprep.subr.bf16.mxu1 %v1813_v0 }
  0x3e   :  { %1398 = vmatpush3.bf16.msra.mxu0 %v1603_v10  ;;  %1418 = vmatpush3.bf16.msra.mxu1 %v1611_v17  ;;  %v1640_v10 = vld [vmem:[#allocation7 + $0x28] sm:$0xff]  }
  0x3f   :  { %1399 = vmatprep.subr.bf16.mxu0 %v1813_v0  ;;  %1419 = vmatprep.subr.bf16.mxu1 %v1813_v0 }
  0x42   :  { %1400 = vmatpush3.bf16.msra.mxu0 %v1604_v11  ;;  %1420 = vmatpush3.bf16.msra.mxu1 %v1612_v18  ;;  %v401_v11 = vld [vmem:[#allocation2 + $0x3] sm:$0x1] }
  0x43   :  { %1401 = vmatprep.subr.bf16.mxu0 %v1813_v0  ;;  %1421 = vmatprep.subr.bf16.mxu1 %v1813_v0 }
  0x46   :  { %1402 = vmatpush3.bf16.msra.mxu0 %v1605_v12  ;;  %1422 = vmatpush3.bf16.msra.mxu1 %v1613_v19  ;;  %v402_v12 = vunpack.c.l.bf16 %v401_v11  ;;  %v1668_v11 = vld [vmem:[#allocation7 + $0x8] sm:$0xff]  }
  0x47   :  { %1427 = vmatprep.subr.bf16.mxu0 %v1813_v0  ;;  %1447 = vmatprep.subr.bf16.mxu1 %v1813_v0 }
  0x49   :  { %1404 = vmatmul.mubr.bf16.vlgmr.msra.gmra.mxu0 %v67_v14 }
  0x4a   :  { %1443 = vmatprep.mubr.msk.bf16.mxu0 %vm1814_vm0, %v1813_v0  ;;  %1428 = vmatpush3.bf16.msra.mxu0 %v1614_v20  ;;  %v1641_v20 = vld [vmem:[#allocation7 + $0x20] sm:$0xff]  }
  0x4b   :  { %1429 = vmatprep.subr.bf16.mxu0 %v1813_v0 }
  0x4e   :  { %1430 = vmatpush3.bf16.msra.mxu0 %v1615_v21  ;;  %v1642_v21 = vld [vmem:[#allocation7 + $0x18] sm:$0xff]  }
  0x4f   :  { %1431 = vmatprep.subr.bf16.mxu0 %v1813_v0 }
  0x52   :  { %1432 = vmatpush3.bf16.msra.mxu0 %v1616_v22  ;;  %v1643_v22 = vld [vmem:[#allocation7 + $0x10] sm:$0xff]  }
  0x53   :  { %1433 = vmatprep.subr.bf16.mxu0 %v1813_v0 }
  0x56   :  { %1434 = vmatpush3.bf16.msra.mxu0 %v1617_v32 }
  0x57   :  { %1435 = vmatprep.subr.bf16.mxu0 %v1813_v0 }
  0x5a   :  { %1436 = vmatpush3.bf16.msra.mxu0 %v1618_v33 }
  0x5b   :  { %1437 = vmatprep.subr.bf16.mxu0 %v1813_v0 }
  0x5e   :  { %1438 = vmatpush3.bf16.msra.mxu0 %v1619_v34 }
  0x5f   :  { %1439 = vmatprep.subr.bf16.mxu0 %v1813_v0 }
  0x62   :  { %1440 = vmatpush3.bf16.msra.mxu0 %v1620_v35 }
  0x63   :  { %1441 = vmatprep.subr.bf16.mxu0 %v1813_v0 }
  0x66   :  { %1442 = vmatpush3.bf16.msra.mxu0 %v1621_v36 }
  0x67   :  { %1467 = vmatprep.subr.bf16.mxu0 %v1813_v0 }
 0x109   :  { %v166_v25 = vpop.f32.mrf.mxu0 }
 0x10a   :  { %v172_v26 = vadd.f32 %v166_v25, %v66_v24  ;;  %v1645_v24 = vld [vmem:[#allocation7] sm:$0xff]   ;;  %v1646_v25 = vld [vmem:[#allocation7 + $0x38] sm:$0xff]  }
 0x10b   :  { %v1405_v27 = vpop.f32.mrf.mxu0 }
 0x10c   :  { %1678 = vtanh.f32 %v172_v26  ;;  %v1647_v26 = vld [vmem:[#allocation7 + $0x30] sm:$0xff]   ;;  %v1648_v27 = vld [vmem:[#allocation7 + $0x28] sm:$0xff]  }
 0x10d   :  { %v169_v28 = vpop.f32.mrf.mxu0 }
 0x10e   :  { %v513_v28 = vld [vmem:[#allocation2 + $0x4] sm:$0x1] }
 0x10f   :  { %v1406_v29 = vpop.f32.mrf.mxu0 }
 0x110   :  { %v514_v29 = vunpack.c.l.bf16 %v513_v28  ;;  %v1676_v28 = vld [vmem:[#allocation7 + $0x8] sm:$0xff]  }
 0x119   :  { %v1679_v30 = vpop.eup %1678 }
 0x11a   :  { %v174_v31 = vpack.c.bf16 %v1679_v30, %v1679_v30 }
 0x11c   :  { %175 = vst [vmem:[#allocation8] sm:$0x1] %v174_v31  ;;  %1424 = vmatmul.mubr.bf16.vlgmr.msra.gmra.mxu1 %v174_v31 }
 0x11d   :  { %1463 = vmatprep.mubr.msk.bf16.mxu1 %vm1814_vm0, %v1813_v0  ;;  %1448 = vmatpush3.bf16.msra.mxu1 %v1622_v37  ;;  %v1649_v37 = vld [vmem:[#allocation7 + $0x20] sm:$0xff]  }
 0x11e   :  { %1449 = vmatprep.subr.bf16.mxu1 %v1813_v0 }
 0x121   :  { %1450 = vmatpush3.bf16.msra.mxu1 %v1623_v38  ;;  %v1650_v38 = vld [vmem:[#allocation7 + $0x18] sm:$0xff]  }
 0x122   :  { %1451 = vmatprep.subr.bf16.mxu1 %v1813_v0 }
 0x125   :  { %1452 = vmatpush3.bf16.msra.mxu1 %v1624_v39  ;;  %v1651_v39 = vld [vmem:[#allocation7 + $0x10] sm:$0xff]  }
 0x126   :  { %1453 = vmatprep.subr.bf16.mxu1 %v1813_v0 }
 0x129   :  { %1454 = vmatpush3.bf16.msra.mxu1 %v1625_v49 }
 0x12a   :  { %1455 = vmatprep.subr.bf16.mxu1 %v1813_v0 }
 0x12d   :  { %1456 = vmatpush3.bf16.msra.mxu1 %v1626_v50 }
 0x12e   :  { %1457 = vmatprep.subr.bf16.mxu1 %v1813_v0 }
 0x131   :  { %1458 = vmatpush3.bf16.msra.mxu1 %v1627_v51 }
 0x132   :  { %1459 = vmatprep.subr.bf16.mxu1 %v1813_v0 }
 0x135   :  { %1460 = vmatpush3.bf16.msra.mxu1 %v1628_v52 }
 0x136   :  { %1461 = vmatprep.subr.bf16.mxu1 %v1813_v0 }
 0x139   :  { %1462 = vmatpush3.bf16.msra.mxu1 %v1629_v53 }
 0x13a   :  { %1487 = vmatprep.subr.bf16.mxu1 %v1813_v0 }
 0x1dc   :  { %v277_v42 = vpop.f32.mrf.mxu1 }
 0x1dd   :  { %v283_v43 = vadd.f32 %v277_v42, %v178_v41  ;;  %v1653_v41 = vld [vmem:[#allocation7] sm:$0xff]   ;;  %v1654_v42 = vld [vmem:[#allocation7 + $0x38] sm:$0xff]  }
 0x1de   :  { %v1425_v44 = vpop.f32.mrf.mxu1 }
 0x1df   :  { %1680 = vtanh.f32 %v283_v43  ;;  %v1655_v43 = vld [vmem:[#allocation7 + $0x30] sm:$0xff]   ;;  %v1656_v44 = vld [vmem:[#allocation7 + $0x28] sm:$0xff]  }
 0x1e0   :  { %v280_v45 = vpop.f32.mrf.mxu1 }
 0x1e1   :  { %v625_v45 = vld [vmem:[#allocation2 + $0x5] sm:$0x1] }
 0x1e2   :  { %v1426_v46 = vpop.f32.mrf.mxu1 }
 0x1e3   :  { %v626_v46 = vunpack.c.l.bf16 %v625_v45 }
 0x1ec   :  { %v1681_v47 = vpop.eup %1680 }
 0x1ed   :  { %v285_v48 = vpack.c.bf16 %v1681_v47, %v1681_v47 }
 0x1ef   :  { %287 = vst [vmem:[#allocation8 + $0x1] sm:$0x1] %v285_v48  ;;  %1444 = vmatmul.mubr.bf16.vlgmr.msra.gmra.mxu0 %v285_v48 }
 0x1f0   :  { %1483 = vmatprep.mubr.msk.bf16.mxu0 %vm1814_vm0, %v1813_v0  ;;  %1468 = vmatpush3.bf16.msra.mxu0 %v1630_v54  ;;  %v1657_v54 = vld [vmem:[#allocation7 + $0x20] sm:$0xff]  }
 0x1f1   :  { %1469 = vmatprep.subr.bf16.mxu0 %v1813_v0 }
 0x1f4   :  { %1470 = vmatpush3.bf16.msra.mxu0 %v1631_v55  ;;  %v1658_v55 = vld [vmem:[#allocation7 + $0x18] sm:$0xff]  }
 0x1f5   :  { %1471 = vmatprep.subr.bf16.mxu0 %v1813_v0 }
 0x1f8   :  { %1472 = vmatpush3.bf16.msra.mxu0 %v1632_v56  ;;  %v1659_v56 = vld [vmem:[#allocation7 + $0x10] sm:$0xff]  }
 0x1f9   :  { %1473 = vmatprep.subr.bf16.mxu0 %v1813_v0 }
 0x1fc   :  { %1474 = vmatpush3.bf16.msra.mxu0 %v1633_v3 }
 0x1fd   :  { %1475 = vmatprep.subr.bf16.mxu0 %v1813_v0 }
 0x200   :  { %1476 = vmatpush3.bf16.msra.mxu0 %v1634_v4 }
 0x201   :  { %1477 = vmatprep.subr.bf16.mxu0 %v1813_v0 }
 0x204   :  { %1478 = vmatpush3.bf16.msra.mxu0 %v1635_v5 }
 0x205   :  { %1479 = vmatprep.subr.bf16.mxu0 %v1813_v0 }
 0x208   :  { %1480 = vmatpush3.bf16.msra.mxu0 %v1636_v6 }
 0x209   :  { %1481 = vmatprep.subr.bf16.mxu0 %v1813_v0 }
 0x20c   :  { %1482 = vmatpush3.bf16.msra.mxu0 %v1637_v7 }
 0x20d   :  { %1507 = vmatprep.subr.bf16.mxu0 %v1813_v0 }
 0x2af   :  { %v389_v59 = vpop.f32.mrf.mxu0 }
 0x2b0   :  { %v395_v60 = vadd.f32 %v389_v59, %v290_v58  ;;  %v1661_v58 = vld [vmem:[#allocation7] sm:$0xff]   ;;  %v1662_v59 = vld [vmem:[#allocation7 + $0x38] sm:$0xff]  }
 0x2b1   :  { %v1445_v61 = vpop.f32.mrf.mxu0 }
 0x2b2   :  { %1682 = vtanh.f32 %v395_v60  ;;  %v1663_v60 = vld [vmem:[#allocation7 + $0x30] sm:$0xff]   ;;  %v1664_v61 = vld [vmem:[#allocation7 + $0x28] sm:$0xff]  }
 0x2b3   :  { %v392_v62 = vpop.f32.mrf.mxu0 }
 0x2b4   :  { %v737_v62 = vld [vmem:[#allocation2 + $0x6] sm:$0x1] }
 0x2b5   :  { %v1446_v63 = vpop.f32.mrf.mxu0 }
 0x2b6   :  { %v738_v63 = vunpack.c.l.bf16 %v737_v62 }
 0x2bf   :  { %v1683_v1 = vpop.eup %1682 }
 0x2c0   :  { %v397_v2 = vpack.c.bf16 %v1683_v1, %v1683_v1 }
 0x2c2   :  { %399 = vst [vmem:[#allocation8 + $0x2] sm:$0x1] %v397_v2  ;;  %1464 = vmatmul.mubr.bf16.vlgmr.msra.gmra.mxu1 %v397_v2 }
 0x2c3   :  { %1503 = vmatprep.mubr.msk.bf16.mxu1 %vm1814_vm0, %v1813_v0  ;;  %1488 = vmatpush3.bf16.msra.mxu1 %v1638_v8  ;;  %v1665_v8 = vld [vmem:[#allocation7 + $0x20] sm:$0xff]  }
 0x2c4   :  { %1489 = vmatprep.subr.bf16.mxu1 %v1813_v0 }
 0x2c7   :  { %1490 = vmatpush3.bf16.msra.mxu1 %v1639_v9  ;;  %v1666_v9 = vld [vmem:[#allocation7 + $0x18] sm:$0xff]  }
 0x2c8   :  { %1491 = vmatprep.subr.bf16.mxu1 %v1813_v0 }
 0x2cb   :  { %1492 = vmatpush3.bf16.msra.mxu1 %v1640_v10  ;;  %v1667_v10 = vld [vmem:[#allocation7 + $0x10] sm:$0xff]  }
 0x2cc   :  { %1493 = vmatprep.subr.bf16.mxu1 %v1813_v0 }
 0x2cf   :  { %1494 = vmatpush3.bf16.msra.mxu1 %v1641_v20 }
 0x2d0   :  { %1495 = vmatprep.subr.bf16.mxu1 %v1813_v0 }
 0x2d3   :  { %1496 = vmatpush3.bf16.msra.mxu1 %v1642_v21 }
 0x2d4   :  { %1497 = vmatprep.subr.bf16.mxu1 %v1813_v0 }
 0x2d7   :  { %1498 = vmatpush3.bf16.msra.mxu1 %v1643_v22 }
 0x2d8   :  { %1499 = vmatprep.subr.bf16.mxu1 %v1813_v0 }
 0x2db   :  { %1500 = vmatpush3.bf16.msra.mxu1 %v1644_v23 }
 0x2dc   :  { %1501 = vmatprep.subr.bf16.mxu1 %v1813_v0 }
 0x2df   :  { %1502 = vmatpush3.bf16.msra.mxu1 %v1645_v24 }
 0x2e0   :  { %1527 = vmatprep.subr.bf16.mxu1 %v1813_v0 }
 0x382   :  { %v501_v13 = vpop.f32.mrf.mxu1 }
 0x383   :  { %v507_v14 = vadd.f32 %v501_v13, %v402_v12  ;;  %v1669_v12 = vld [vmem:[#allocation7] sm:$0xff]   ;;  %v1670_v13 = vld [vmem:[#allocation7 + $0x38] sm:$0xff]  }
 0x384   :  { %v1465_v15 = vpop.f32.mrf.mxu1 }
 0x385   :  { %1684 = vtanh.f32 %v507_v14  ;;  %v1671_v14 = vld [vmem:[#allocation7 + $0x30] sm:$0xff]   ;;  %v1672_v15 = vld [vmem:[#allocation7 + $0x28] sm:$0xff]  }
 0x386   :  { %v504_v16 = vpop.f32.mrf.mxu1 }
 0x387   :  { %v849_v16 = vld [vmem:[#allocation2 + $0x7] sm:$0x1] }
 0x388   :  { %v1466_v17 = vpop.f32.mrf.mxu1 }
 0x389   :  { %v850_v17 = vunpack.c.l.bf16 %v849_v16 }
 0x392   :  { %v1685_v18 = vpop.eup %1684 }
 0x393   :  { %v509_v19 = vpack.c.bf16 %v1685_v18, %v1685_v18 }
 0x395   :  { %511 = vst [vmem:[#allocation8 + $0x3] sm:$0x1] %v509_v19  ;;  %1484 = vmatmul.mubr.bf16.vlgmr.msra.gmra.mxu0 %v509_v19 }
 0x396   :  { %1523 = vmatprep.mubr.msk.bf16.mxu0 %vm1814_vm0, %v1813_v0  ;;  %1508 = vmatpush3.bf16.msra.mxu0 %v1646_v25  ;;  %v1673_v25 = vld [vmem:[#allocation7 + $0x20] sm:$0xff]  }
 0x397   :  { %1509 = vmatprep.subr.bf16.mxu0 %v1813_v0 }
 0x39a   :  { %1510 = vmatpush3.bf16.msra.mxu0 %v1647_v26  ;;  %v1674_v26 = vld [vmem:[#allocation7 + $0x18] sm:$0xff]  }
 0x39b   :  { %1511 = vmatprep.subr.bf16.mxu0 %v1813_v0 }
 0x39e   :  { %1512 = vmatpush3.bf16.msra.mxu0 %v1648_v27  ;;  %v1675_v27 = vld [vmem:[#allocation7 + $0x10] sm:$0xff]  }
 0x39f   :  { %1513 = vmatprep.subr.bf16.mxu0 %v1813_v0 }
 0x3a2   :  { %1514 = vmatpush3.bf16.msra.mxu0 %v1649_v37 }
 0x3a3   :  { %1515 = vmatprep.subr.bf16.mxu0 %v1813_v0 }
 0x3a6   :  { %1516 = vmatpush3.bf16.msra.mxu0 %v1650_v38 }
 0x3a7   :  { %1517 = vmatprep.subr.bf16.mxu0 %v1813_v0 }
 0x3aa   :  { %1518 = vmatpush3.bf16.msra.mxu0 %v1651_v39  ;;  %v1073_v39 = vld [vmem:[#allocation2 + $0x9] sm:$0x1] }
 0x3ab   :  { %1519 = vmatprep.subr.bf16.mxu0 %v1813_v0 }
 0x3ae   :  { %1520 = vmatpush3.bf16.msra.mxu0 %v1652_v40  ;;  %v1074_v40 = vunpack.c.l.bf16 %v1073_v39 }
 0x3af   :  { %1521 = vmatprep.subr.bf16.mxu0 %v1813_v0 }
 0x3b2   :  { %1522 = vmatpush3.bf16.msra.mxu0 %v1653_v41 }
 0x3b3   :  { %1547 = vmatprep.subr.bf16.mxu0 %v1813_v0 }
 0x455   :  { %v613_v30 = vpop.f32.mrf.mxu0 }
 0x456   :  { %v619_v31 = vadd.f32 %v613_v30, %v514_v29  ;;  %v1677_v29 = vld [vmem:[#allocation7] sm:$0xff]   ;;  %v961_v30 = vld [vmem:[#allocation2 + $0x8] sm:$0x1] }
 0x457   :  { %v1485_v32 = vpop.f32.mrf.mxu0 }
 0x458   :  { %1686 = vtanh.f32 %v619_v31  ;;  %v962_v31 = vunpack.c.l.bf16 %v961_v30 }
 0x459   :  { %v616_v33 = vpop.f32.mrf.mxu0 }
 0x45b   :  { %v1486_v34 = vpop.f32.mrf.mxu0 }
 0x465   :  { %v1687_v35 = vpop.eup %1686 }
 0x466   :  { %v621_v36 = vpack.c.bf16 %v1687_v35, %v1687_v35 }
 0x468   :  { %623 = vst [vmem:[#allocation8 + $0x4] sm:$0x1] %v621_v36  ;;  %1504 = vmatmul.mubr.bf16.vlgmr.msra.gmra.mxu1 %v621_v36 }
 0x469   :  { %1543 = vmatprep.mubr.msk.bf16.mxu1 %vm1814_vm0, %v1813_v0  ;;  %1528 = vmatpush3.bf16.msra.mxu1 %v1654_v42 }
 0x46a   :  { %1529 = vmatprep.subr.bf16.mxu1 %v1813_v0 }
 0x46d   :  { %1530 = vmatpush3.bf16.msra.mxu1 %v1655_v43 }
 0x46e   :  { %1531 = vmatprep.subr.bf16.mxu1 %v1813_v0 }
 0x471   :  { %1532 = vmatpush3.bf16.msra.mxu1 %v1656_v44 }
 0x472   :  { %1533 = vmatprep.subr.bf16.mxu1 %v1813_v0 }
 0x475   :  { %1534 = vmatpush3.bf16.msra.mxu1 %v1657_v54 }
 0x476   :  { %1535 = vmatprep.subr.bf16.mxu1 %v1813_v0 }
 0x479   :  { %1536 = vmatpush3.bf16.msra.mxu1 %v1658_v55 }
 0x47a   :  { %1537 = vmatprep.subr.bf16.mxu1 %v1813_v0 }
 0x47d   :  { %1538 = vmatpush3.bf16.msra.mxu1 %v1659_v56 }
 0x47e   :  { %1539 = vmatprep.subr.bf16.mxu1 %v1813_v0 }
 0x481   :  { %1540 = vmatpush3.bf16.msra.mxu1 %v1660_v57 }
 0x482   :  { %1541 = vmatprep.subr.bf16.mxu1 %v1813_v0 }
 0x485   :  { %1542 = vmatpush3.bf16.msra.mxu1 %v1661_v58 }
 0x486   :  { %1567 = vmatprep.subr.bf16.mxu1 %v1813_v0 }
 0x528   :  { %v725_v47 = vpop.f32.mrf.mxu1 }
 0x529   :  { %v731_v48 = vadd.f32 %v725_v47, %v626_v46 }
 0x52a   :  { %v1505_v49 = vpop.f32.mrf.mxu1 }
 0x52b   :  { %1688 = vtanh.f32 %v731_v48 }
 0x52c   :  { %v728_v50 = vpop.f32.mrf.mxu1 }
 0x52e   :  { %v1506_v51 = vpop.f32.mrf.mxu1 }
 0x538   :  { %v1689_v52 = vpop.eup %1688 }
 0x539   :  { %v733_v53 = vpack.c.bf16 %v1689_v52, %v1689_v52 }
 0x53b   :  { %735 = vst [vmem:[#allocation8 + $0x5] sm:$0x1] %v733_v53  ;;  %1524 = vmatmul.mubr.bf16.vlgmr.msra.gmra.mxu0 %v733_v53 }
 0x53c   :  { %1563 = vmatprep.mubr.msk.bf16.mxu0 %vm1814_vm0, %v1813_v0  ;;  %1548 = vmatpush3.bf16.msra.mxu0 %v1662_v59 }
 0x53d   :  { %1549 = vmatprep.subr.bf16.mxu0 %v1813_v0 }
 0x540   :  { %1550 = vmatpush3.bf16.msra.mxu0 %v1663_v60 }
 0x541   :  { %1551 = vmatprep.subr.bf16.mxu0 %v1813_v0 }
 0x544   :  { %1552 = vmatpush3.bf16.msra.mxu0 %v1664_v61 }
 0x545   :  { %1553 = vmatprep.subr.bf16.mxu0 %v1813_v0 }
 0x548   :  { %1554 = vmatpush3.bf16.msra.mxu0 %v1665_v8 }
 0x549   :  { %1555 = vmatprep.subr.bf16.mxu0 %v1813_v0 }
 0x54c   :  { %1556 = vmatpush3.bf16.msra.mxu0 %v1666_v9 }
 0x54d   :  { %1557 = vmatprep.subr.bf16.mxu0 %v1813_v0 }
 0x550   :  { %1558 = vmatpush3.bf16.msra.mxu0 %v1667_v10 }
 0x551   :  { %1559 = vmatprep.subr.bf16.mxu0 %v1813_v0 }
 0x554   :  { %1560 = vmatpush3.bf16.msra.mxu0 %v1668_v11 }
 0x555   :  { %1561 = vmatprep.subr.bf16.mxu0 %v1813_v0 }
 0x558   :  { %1562 = vmatpush3.bf16.msra.mxu0 %v1669_v12 }
 0x5fb   :  { %v837_v1 = vpop.f32.mrf.mxu0 }
 0x5fc   :  { %v843_v2 = vadd.f32 %v837_v1, %v738_v63 }
 0x5fd   :  { %v1525_v3 = vpop.f32.mrf.mxu0 }
 0x5fe   :  { %1690 = vtanh.f32 %v843_v2 }
 0x5ff   :  { %v840_v4 = vpop.f32.mrf.mxu0 }
 0x601   :  { %v1526_v5 = vpop.f32.mrf.mxu0 }
 0x60b   :  { %v1691_v6 = vpop.eup %1690 }
 0x60c   :  { %v845_v7 = vpack.c.bf16 %v1691_v6, %v1691_v6 }
 0x60e   :  { %847 = vst [vmem:[#allocation8 + $0x6] sm:$0x1] %v845_v7  ;;  %1544 = vmatmul.mubr.bf16.vlgmr.msra.gmra.mxu1 %v845_v7 }
 0x60f   :  { %1583 = vmatprep.mubr.msk.bf16.mxu1 %vm1814_vm0, %v1813_v0  ;;  %1568 = vmatpush3.bf16.msra.mxu1 %v1670_v13 }
 0x610   :  { %1569 = vmatprep.subr.bf16.mxu1 %v1813_v0 }
 0x613   :  { %1570 = vmatpush3.bf16.msra.mxu1 %v1671_v14 }
 0x614   :  { %1571 = vmatprep.subr.bf16.mxu1 %v1813_v0 }
 0x617   :  { %1572 = vmatpush3.bf16.msra.mxu1 %v1672_v15 }
 0x618   :  { %1573 = vmatprep.subr.bf16.mxu1 %v1813_v0 }
 0x61b   :  { %1574 = vmatpush3.bf16.msra.mxu1 %v1673_v25 }
 0x61c   :  { %1575 = vmatprep.subr.bf16.mxu1 %v1813_v0 }
 0x61f   :  { %1576 = vmatpush3.bf16.msra.mxu1 %v1674_v26 }
 0x620   :  { %1577 = vmatprep.subr.bf16.mxu1 %v1813_v0 }
 0x623   :  { %1578 = vmatpush3.bf16.msra.mxu1 %v1675_v27 }
 0x624   :  { %1579 = vmatprep.subr.bf16.mxu1 %v1813_v0 }
 0x627   :  { %1580 = vmatpush3.bf16.msra.mxu1 %v1676_v28 }
 0x628   :  { %1581 = vmatprep.subr.bf16.mxu1 %v1813_v0 }
 0x62b   :  { %1582 = vmatpush3.bf16.msra.mxu1 %v1677_v29 }
 0x6ce   :  { %v949_v18 = vpop.f32.mrf.mxu1 }
 0x6cf   :  { %v955_v19 = vadd.f32 %v949_v18, %v850_v17 }
 0x6d0   :  { %v1545_v20 = vpop.f32.mrf.mxu1 }
 0x6d1   :  { %1692 = vtanh.f32 %v955_v19 }
 0x6d2   :  { %v952_v21 = vpop.f32.mrf.mxu1 }
 0x6d4   :  { %v1546_v22 = vpop.f32.mrf.mxu1 }
 0x6de   :  { %v1693_v23 = vpop.eup %1692 }
 0x6df   :  { %v957_v24 = vpack.c.bf16 %v1693_v23, %v1693_v23 }
 0x6e1   :  { %959 = vst [vmem:[#allocation8 + $0x7] sm:$0x1] %v957_v24  ;;  %1564 = vmatmul.mubr.bf16.vlgmr.msra.gmra.mxu0 %v957_v24 }
 0x7a1   :  { %v1061_v32 = vpop.f32.mrf.mxu0 }
 0x7a2   :  { %v1067_v33 = vadd.f32 %v1061_v32, %v962_v31 }
 0x7a3   :  { %v1565_v34 = vpop.f32.mrf.mxu0 }
 0x7a4   :  { %1694 = vtanh.f32 %v1067_v33 }
 0x7a5   :  { %v1064_v35 = vpop.f32.mrf.mxu0 }
 0x7a7   :  { %v1566_v36 = vpop.f32.mrf.mxu0 }
 0x7b1   :  { %v1695_v37 = vpop.eup %1694 }
 0x7b2   :  { %v1069_v38 = vpack.c.bf16 %v1695_v37, %v1695_v37 }
 0x7b4   :  { %1071 = vst [vmem:[#allocation8 + $0x8] sm:$0x1] %v1069_v38  ;;  %1584 = vmatmul.mubr.bf16.vlgmr.msra.gmra.mxu1 %v1069_v38 }
 0x874   :  { %v1173_v41 = vpop.f32.mrf.mxu1 }
 0x875   :  { %v1179_v42 = vadd.f32 %v1173_v41, %v1074_v40 }
 0x876   :  { %v1585_v43 = vpop.f32.mrf.mxu1 }
 0x877   :  { %1696 = vtanh.f32 %v1179_v42 }
 0x878   :  { %v1176_v0 = vpop.f32.mrf.mxu1 }
 0x87a   :  { %v1586_v44 = vpop.f32.mrf.mxu1 }
 0x884   :  { %v1697_v45 = vpop.eup %1696 }
 0x885   :  { %v1181_v46 = vpack.c.bf16 %v1697_v45, %v1697_v45  ;;  %1184 = vst [vmem:[#allocation9] sm:$0x3] %v1697_v45 }
 0x886   :  { %1769 = shalt.err (!%p1766_p5)
}
 0x887   :  { %1206 = dma.vmem_to_hbm [thread:$0]  %s1204_s2, 32, %s1967_s4, [#allocation10]   ;;  %1183 = vst [vmem:[#allocation8 + $0x9] sm:$0x1] %v1181_v46 }
 0x888   :  { %s1778_s12 = scalar_lea.vmem %s1191_s8, 160  ;;  %p1783_p7 = scmp.lt.s32.totalorder %s1191_s8, %s1191_s8 }
 0x889   :  { %p1779_p6 = scmp.ne.s32.totalorder %s1191_s8, %s1778_s12  ;;  %p1784_p8 = scmp.lt.s32.totalorder %s1778_s12, %s1778_s12 }
 0x88b   :  { %p1785_p9 = por %p1784_p8, %p1783_p7 }
 0x88d   :  { %p1786_p10 = pnand %p1785_p9, %p1779_p6 }
 0x88f   :  { %1789 = shalt.err (!%p1786_p10)
}
 0x890   :  { %1196 = dma.vmem_to_hbm [thread:$0]  %s1191_s8, 160, %s1966_s3, [#allocation4], %s1808_s23, %s1808_s23, %s1809_s24  }
 0x891   :  { %1802 = dma.done.wait [#allocation4], 160  }
 0x892   :  { %1803 = vsyncadd [#allocation4], 4294967136 }
 0x893   :  { %1804 = dma.done.wait [#allocation10], 32  }
 0x894   :  { %1805 = vsyncadd [#allocation10], 4294967264 }
 0x895   :  { %1213 = vsyncpa [#allocation3], 1 }
 0x896   :  { %1214 = vsyncpa [#allocation6], 1 }
 0x897   :  { %1215 = vsyncpa [#allocation4], 1 }
 0x898   :  { %1216 = vsyncpa [#allocation10], 1 }

</bundles_post_ra>
